<compile_context>
chip_gen: v7x
topology: tpu7x:2x2x1
jax: 0.10.0
libtpu: 0.0.40
codegen_flags: <defaults>
</compile_context>

<pallas_src>
import functools

import jax
import jax.numpy as jnp
from jax.experimental import pallas as pl
from jax.experimental.pallas import tpu as pltpu


LANE = 128                  # vreg lane width
SUBLANE_BF16 = 16           # bf16 min sublane tile (rows pack in pairs)
MAX_TM = 512                # default batch rows per grid step
MAX_TM_SMALL_WEIGHT = 1024  # used when the per-step weight block is tiny
SPLIT_ROWS = 128            # batch above which we force >=2 grid steps (v7x: 2 TCs)
# Weight kept fully VMEM-resident only below this size (conservative for
# v7x's 64 MiB VMEM); above it the N dimension is tiled.
MAX_RESIDENT_WEIGHT_BYTES = 8 * 1024 * 1024


def _round_up(x: int, m: int) -> int:
    return pl.cdiv(x, m) * m


def _linear_kernel(x_ref, w_ref, b_ref, o_ref):
    # One MXU matmul (bf16 operands, f32 accumulation) + broadcast bias add.
    acc = jnp.dot(x_ref[...], w_ref[...], preferred_element_type=jnp.float32)
    o_ref[...] = (acc + b_ref[...].astype(jnp.float32)).astype(o_ref.dtype)


def prepare_linear_params(weight, bias):
    """One-time parameter prep (NOT per forward call).

    weight: (D_out, D_in) PyTorch layout; bias: (D_out,).
    Returns bf16 w_p (D_in, N_pad) and b_p (1, N_pad). N_pad is lane-dense:
    a multiple of 128 (256 for d_out > 128 to fill the v6e/v7x MXU width).
    """
    d_out, d_in = weight.shape
    n_pad = _round_up(d_out, LANE if d_out <= LANE else 2 * LANE)
    w_p = jnp.zeros((d_in, n_pad), dtype=jnp.bfloat16)
    w_p = w_p.at[:, :d_out].set(weight.T.astype(jnp.bfloat16))  # transpose once
    b_p = jnp.zeros((1, n_pad), dtype=jnp.bfloat16)
    b_p = b_p.at[0, :d_out].set(bias.astype(jnp.bfloat16))
    return w_p, b_p


@functools.partial(jax.jit, static_argnames=("d_out",))
def linear_forward(x, w_p, b_p, *, d_out):
    """x: (B, D_in) f32; w_p: (D_in, N_pad) bf16; b_p: (1, N_pad) bf16.

    Returns (B, d_out) f32.
    """
    b_rows, d_in = x.shape
    n_pad = w_p.shape[1]

    # bf16 operands halve HBM bytes; the kernel still accumulates in f32.
    x = x.astype(jnp.bfloat16)

    # Pad batch only to the bf16 sublane granule (<= 15 extra rows); the
    # boundary grid block (if any) is handled by Pallas, not wrapper padding.
    b_pad = _round_up(b_rows, SUBLANE_BF16)
    if b_pad != b_rows:
        x = jnp.pad(x, ((0, b_pad - b_rows), (0, 0)))

    # --- N tiling: only when the weight can't stay VMEM-resident. ---
    if d_in * n_pad * 2 <= MAX_RESIDENT_WEIGHT_BYTES:
        tn = n_pad
    else:
        tn = min(n_pad, 512)
    grid_n = pl.cdiv(n_pad, tn)

    # --- Batch tiling. ---
    max_tm = MAX_TM_SMALL_WEIGHT if d_in * tn * 2 <= (4 << 20) else MAX_TM
    if b_pad <= SPLIT_ROWS:
        tm = b_pad                                   # single block, small batch
    else:
        # At least two batch blocks so v7x's second TensorCore has work.
        tm = min(max_tm, _round_up(pl.cdiv(b_pad, 2), SUBLANE_BF16))
    grid_m = pl.cdiv(b_pad, tm)

    # Weight / bias are grid-invariant when grid_n == 1 -> single buffer.
    if grid_n == 1:
        w_spec = pl.BlockSpec((d_in, tn), lambda i, j: (0, j),
                              pipeline_mode=pl.Buffered(1))
        b_spec = pl.BlockSpec((1, tn), lambda i, j: (0, j),
                              pipeline_mode=pl.Buffered(1))
        w_bufs = 1
    else:
        w_spec = pl.BlockSpec((d_in, tn), lambda i, j: (0, j))
        b_spec = pl.BlockSpec((1, tn), lambda i, j: (0, j))
        w_bufs = 2

    # VMEM budget from the real buffer counts (x/out double-buffered), with
    # 2x headroom for Mosaic scratch; capped below v7x's 64 MiB physical VMEM.
    buf_bytes = (2 * tm * d_in * 2            # x tiles   (bf16, 2 buffers)
                 + w_bufs * d_in * tn * 2     # weight    (bf16)
                 + w_bufs * tn * 2            # bias      (bf16)
                 + 2 * tm * tn * 4)           # out tiles (f32, 2 buffers)
    vmem_limit = min(48 * 1024 * 1024, max(2 * buf_bytes, 16 * 1024 * 1024))

    out = pl.pallas_call(
        _linear_kernel,
        out_shape=jax.ShapeDtypeStruct((b_pad, n_pad), jnp.float32),
        grid_spec=pltpu.PrefetchScalarGridSpec(
            num_scalar_prefetch=0,
            grid=(grid_m, grid_n),
            in_specs=[
                pl.BlockSpec((tm, d_in), lambda i, j: (i, 0)),  # x: batch tiles
                w_spec,                                          # weight
                b_spec,                                          # bias
            ],
            out_specs=pl.BlockSpec((tm, tn), lambda i, j: (i, j)),
        ),
        compiler_params=pltpu.CompilerParams(
            dimension_semantics=("parallel", "parallel"),
            vmem_limit_bytes=vmem_limit,
        ),
        cost_estimate=pl.CostEstimate(
            flops=2 * b_pad * d_in * n_pad,
            transcendentals=0,
            bytes_accessed=2 * (b_pad * d_in + d_in * n_pad + n_pad)
                           + 4 * b_pad * n_pad,
        ),
    )(x, w_p, b_p)

    return out[:b_rows, :d_out]


if __name__ == "__main__":
    # Small shapes consistent with the module: batch=8, input_dim=32, output_dim=16.
    # Note: at these shapes the call is pure launch/DMA overhead; in a real
    # model this linear should be fused into the surrounding graph or batched.
    B, D_in, D_out = 8, 32, 16

    key = jax.random.PRNGKey(0)
    kx, kw, kb = jax.random.split(key, 3)

    x = jax.random.normal(kx, (B, D_in), dtype=jnp.float32)
    # Mimic nn.Linear's uniform(-1/sqrt(in), 1/sqrt(in)) init, deterministically.
    bound = 1.0 / jnp.sqrt(jnp.float32(D_in))
    weight = jax.random.uniform(kw, (D_out, D_in), dtype=jnp.float32,
                                minval=-bound, maxval=bound)
    bias = jax.random.uniform(kb, (D_out,), dtype=jnp.float32,
                              minval=-bound, maxval=bound)

    # One-time parameter preparation (pad to lane-dense N, transpose, bf16 cast).
    w_p, b_p = prepare_linear_params(weight, bias)

    out = linear_forward(x, w_p, b_p, d_out=D_out)
    out = jax.block_until_ready(out)

    # Reference check against plain JAX (f32). Tolerance loosened for bf16
    # operands; accumulation inside the kernel is f32.
    ref = x @ weight.T + bias
    assert out.shape == (B, D_out)
    assert jnp.allclose(out, ref, atol=2e-2, rtol=2e-2), "mismatch vs reference"

    print("KERNEL_OK")
</pallas_src>

<mosaic_0001>
module attributes {stable_mosaic.version = 11 : i64} {
  func.func @_linear_kernel(%arg0: i32, %arg1: i32, %arg2: memref<16x32xbf16, #tpu.memory_space<vmem>>, %arg3: memref<32x128xbf16, #tpu.memory_space<vmem>>, %arg4: memref<1x128xbf16, #tpu.memory_space<vmem>>, %arg5: memref<16x128xf32, #tpu.memory_space<vmem>>) attributes {dimension_semantics = [#tpu.dimension_semantics<parallel>, #tpu.dimension_semantics<parallel>], iteration_bounds = array<i64: 1, 1>, scalar_prefetch = 0 : i64, scratch_operands = 0 : i64, tpu.core_type = #tpu.core_type<tc>, window_params = [{transform_indices = @transform_0, window_bounds = array<i64: 16, 32>}, {pipeline_mode = #tpu.pipeline_mode<synchronous>, transform_indices = @transform_1, window_bounds = array<i64: 32, 128>}, {pipeline_mode = #tpu.pipeline_mode<synchronous>, transform_indices = @transform_2, window_bounds = array<i64: 1, 128>}, {transform_indices = @transform_3, window_bounds = array<i64: 16, 128>}]} {
    %c0 = arith.constant 0 : index
    %c0_0 = arith.constant 0 : index
    %0 = vector.load %arg2[%c0, %c0_0] : memref<16x32xbf16, #tpu.memory_space<vmem>>, vector<16x32xbf16>
    %c0_1 = arith.constant 0 : index
    %c0_2 = arith.constant 0 : index
    %1 = vector.load %arg3[%c0_1, %c0_2] : memref<32x128xbf16, #tpu.memory_space<vmem>>, vector<32x128xbf16>
    %cst = arith.constant dense<0.000000e+00> : vector<16x128xf32>
    %2 = tpu.matmul %0, %1, %cst {dimension_numbers = #tpu.dot_dimension_numbers<[1], [0], [0], [1], [0, 0, 1, 1], [], []>} : vector<16x32xbf16>, vector<32x128xbf16>, vector<16x128xf32> -> vector<16x128xf32>
    %c0_3 = arith.constant 0 : index
    %c0_4 = arith.constant 0 : index
    %3 = vector.load %arg4[%c0_3, %c0_4] : memref<1x128xbf16, #tpu.memory_space<vmem>>, vector<1x128xbf16>
    %4 = arith.extf %3 : vector<1x128xbf16> to vector<1x128xf32>
    %5 = vector.broadcast %4 : vector<1x128xf32> to vector<16x128xf32>
    %6 = arith.addf %2, %5 : vector<16x128xf32>
    %c0_5 = arith.constant 0 : index
    %c0_6 = arith.constant 0 : index
    %7 = vector.load %arg5[%c0_5, %c0_6] : memref<16x128xf32, #tpu.memory_space<vmem>>, vector<16x128xf32>
    tpu.vector_store %arg5[%c0_5, %c0_6], %6 {strides = array<i32>} : memref<16x128xf32, #tpu.memory_space<vmem>>, vector<16x128xf32>,
    return
  }
  func.func @transform_0(%arg0: i32, %arg1: i32) -> (i32, i32) {
    %c0_i32 = arith.constant 0 : i32
    %c0_i32_0 = arith.constant 0 : i32
    return %arg0, %c0_i32 : i32, i32
  }
  func.func @transform_1(%arg0: i32, %arg1: i32) -> (i32, i32) {
    %c0_i32 = arith.constant 0 : i32
    %c0_i32_0 = arith.constant 0 : i32
    return %c0_i32, %arg1 : i32, i32
  }
  func.func @transform_2(%arg0: i32, %arg1: i32) -> (i32, i32) {
    %c0_i32 = arith.constant 0 : i32
    %c0_i32_0 = arith.constant 0 : i32
    return %c0_i32, %arg1 : i32, i32
  }
  func.func @transform_3(%arg0: i32, %arg1: i32) -> (i32, i32) {
    %c0_i32 = arith.constant 0 : i32
    return %arg0, %arg1 : i32, i32
  }
}

</mosaic_0001>

<bundles_post_ra>
// kernel: linear_forward.1
= control target key start
LH: loop header
LB: loop body
LE: loop exit
PB: predicated region body
PF: predicated region fallthrough
CT: control target
= control target key end

     0   :  { %v115_v0 = vmov 0.0   ;;  %vm116_vm0 = vmmov 0   ;;  %vm44_vm1 = vcmask 261120   ;;  %v23_v4 = vlaneseq  ;;  %s155_s1 = inlined_call_operand.vmem [shape: bf16[32,128], index: 1, kind: input, shape index: {}]   ;;  %s156_s0 = inlined_call_operand.vmem [shape: bf16[16,32], index: 0, kind: input, shape index: {}]   ;;  %s157_s2 = inlined_call_operand.vmem [shape: bf16[1,128], index: 2, kind: input, shape index: {}]   ;;  %s158_s3 = inlined_call_operand.vmem [shape: f32[16,128], index: 3, kind: output, shape index: {}]  }
   0x1   :  { %102 = vmatprep.subr.bf16.mxu0 %v115_v0  ;;  %v112_v1 = vld [vmem:[%s155_s1] sm:$0xff]   ;;  %106 = vmatprep.mubr.msk.bf16.mxu0 %vm116_vm0, %v115_v0  ;;  %v113_v2 = vld [vmem:[%s155_s1 + $0x8] sm:$0xff]  }
   0x2   :  { %103 = vmatpush3.bf16.msra.mxu0 %v112_v1  ;;  %v114_v3 = vld [vmem:[%s156_s0] sm:$0xff]   ;;  %v24_v5 = vshrl.u32 %v23_v4, 7 }
   0x3   :  { %104 = vmatprep.subr.bf16.mxu0 %v115_v0  ;;  %v21_v6 = vld [vmem:[%s157_s2] sm:$0x1] }
   0x4   :  { %v22_v7 = vunpack.c.l.bf16 %v21_v6  ;;  %v25_v8 = vsub.s32 0, %v24_v5 }
   0x6   :  { %105 = vmatpush3.bf16.msra.mxu0 %v113_v2  ;;  %v26_v9 = vrot.slane %v22_v7, %v25_v8 }
   0x9   :  { %107 = vmatmul.mubr.msk.bf16.vlgmr.msra.gmra.mrb[0].mxu0 %vm44_vm1, %v114_v3 }
  0xdc   :  { %v82_v10 = vpop.f32.mrb[0].mxu0 }
  0xdd   :  { %v83_v11 = vadd.f32 %v82_v10, %v26_v9  ;;  %v108_v12 = vpop.f32.mrb[1].mxu0 }
  0xde   :  { %v85_v13 = vpop.f32.mrb[2].mxu0 }
  0xdf   :  { %89 = vst [vmem:[%s158_s3] sm:$0xff] %v83_v11  ;;  %v86_v14 = vadd.f32 %v85_v13, %v26_v9  ;;  %v109_v15 = vpop.f32.mrb[3].mxu0 }
  0xe1   :  { %90 = vst [vmem:[%s158_s3 + $0x8] sm:$0xff] %v86_v14 }

</bundles_post_ra>
